<compile_context>
chip_gen: v6e
topology: v6e:2x2x1
jax: 0.10.0
libtpu: 0.0.40
codegen_flags: <defaults>
</compile_context>

<pallas_src>
import jax
import jax.numpy as jnp
from jax.experimental import pallas as pl
from jax.experimental.pallas import tpu as pltpu

LANE = 128


def _round_up(n, m):
    return ((n + m - 1) // m) * m


def mlp_kernel(x_ref,
               w1_ref, b1_ref,
               w2_ref, b2_ref,
               w3_ref, b3_ref,
               w4_ref, b4_ref,
               o_ref):
    """Fused (Linear+ReLU) x3 + Linear on one batch tile.

    Weights/biases are VMEM-resident (constant block index); biases are (1, N)
    f32 rows broadcast over the tile; every dot accumulates in f32 on the MXU.
    """
    wdt = w1_ref.dtype
    x = x_ref[...]
    if x.dtype != wdt:            # trace-time branch: only emitted for the
        x = x.astype(wdt)         # explicit bf16-params opt-in (f32 default
                                  # path has zero casts -> v5e friendly)

    def layer(h, w_ref, b_ref):
        acc = jnp.dot(h, w_ref[...], preferred_element_type=jnp.float32)
        acc = jnp.maximum(acc + b_ref[...], 0.0)
        if wdt != jnp.float32:    # only when params are low-precision
            acc = acc.astype(wdt)
        return acc

    h = layer(x, w1_ref, b1_ref)
    h = layer(h, w2_ref, b2_ref)
    h = layer(h, w3_ref, b3_ref)
    acc = jnp.dot(h, w4_ref[...], preferred_element_type=jnp.float32)
    o_ref[...] = (acc + b4_ref[...]).astype(o_ref.dtype)


def prepare_params(params, *, dtype=jnp.float32, lane=LANE):
    """One-time packing of Net2 params for the kernel.

    Call OUTSIDE the hot path (e.g. right after loading weights):
      * every hidden/output width is zero-padded to a multiple of `lane` so
        in-kernel intermediates and the output store are lane-dense (exact:
        zero columns stay zero through bias+ReLU and the next layer's zero
        rows);
      * `dtype` lets you opt in to bf16 weights ONCE here instead of casting
        on every forward call (per-call casts are un-fused HBM round trips);
      * biases stay f32 (they are added to the f32 accumulator).
    """
    (w1, b1), (w2, b2), (w3, b3), (w4, b4) = params
    F = w1.shape[0]
    H1, H2, H3, O = (w.shape[1] for w in (w1, w2, w3, w4))
    H1p, H2p, H3p, Op = (_round_up(d, lane) for d in (H1, H2, H3, O))

    def pad_w(w, rows_to, cols_to):
        r, c = w.shape
        return jnp.pad(w, ((0, rows_to - r), (0, cols_to - c))).astype(dtype)

    def pad_b(b, cols_to):
        b = b.reshape(1, -1).astype(jnp.float32)
        return jnp.pad(b, ((0, 0), (0, cols_to - b.shape[1])))

    arrays = (
        pad_w(w1, F,   H1p), pad_b(b1, H1p),
        pad_w(w2, H1p, H2p), pad_b(b2, H2p),
        pad_w(w3, H2p, H3p), pad_b(b3, H3p),
        pad_w(w4, H3p, Op),  pad_b(b4, Op),
    )
    return {"arrays": arrays, "n_feature": F, "n_output": O}


def net2_forward(x, prepared, *, tile_b=None, num_batch_tiles=2,
                 out_dtype=None):
    """Fused Net2 forward as a single Pallas kernel.

    `prepared` comes from prepare_params().  The grid tiles only the batch
    dimension; weights/biases use a constant index_map so their DMA is not
    re-issued across batch tiles.
    """
    arrays = prepared["arrays"]
    F = prepared["n_feature"]
    O = prepared["n_output"]
    H1p = arrays[0].shape[1]
    H2p = arrays[2].shape[1]
    H3p = arrays[4].shape[1]
    Op = arrays[6].shape[1]

    B, Fx = x.shape
    assert Fx == F, f"expected {F} input features, got {Fx}"
    if out_dtype is None:
        out_dtype = x.dtype

    x_isz = jnp.dtype(x.dtype).itemsize
    out_isz = jnp.dtype(out_dtype).itemsize
    w_isz = jnp.dtype(arrays[0].dtype).itemsize
    sublane = 32 // min(x_isz, out_isz, w_isz)   # 8 for f32, 16 for bf16

    # Batch tiling.  Tiles round up only to the sublane quantum (B=300 -> 304
    # padded rows, not 512).  Small batches are split into `num_batch_tiles`
    # grid steps so dimension_semantics=("parallel",) can shard them across
    # v7x's two TensorCores; on v5e/v6e the MXU pass count is unchanged and
    # the extra ~0.35us grid step is noise.  Large batches use 512-row tiles
    # to feed the MXU M dimension.
    if tile_b is None:
        if B >= 1024:
            tile_b = 512
        else:
            n = max(1, min(num_batch_tiles, pl.cdiv(B, sublane)))
            tile_b = _round_up(pl.cdiv(B, n), sublane)
    else:
        tile_b = _round_up(max(tile_b, sublane), sublane)

    grid_b = pl.cdiv(B, tile_b)
    B_pad = grid_b * tile_b
    x_p = x if B_pad == B else jnp.pad(x, ((0, B_pad - B), (0, 0)))

    # Cost metadata reflecting what is actually read/written (no wrapper-side
    # dtype conversions any more).
    param_bytes = sum(a.size * a.dtype.itemsize for a in arrays)
    flops = 2 * B_pad * (F * H1p + H1p * H2p + H2p * H3p + H3p * Op)
    bytes_accessed = B_pad * F * x_isz + B_pad * Op * out_isz + param_bytes
    cost = pl.CostEstimate(flops=flops, transcendentals=0,
                           bytes_accessed=bytes_accessed)

    # Explicit VMEM budget: double-buffered x/out tiles + resident params +
    # intermediate headroom.  Keeps the kernel honest on v7x (64 MiB VMEM,
    # 32 MiB scoped default) if hidden widths are scaled up.
    tile_bytes = tile_b * (F * x_isz + Op * out_isz)
    inter_bytes = 4 * tile_b * max(H1p, H2p, H3p, Op) * 4
    vmem_limit = int(min(max(4 * (2 * tile_bytes + 2 * param_bytes
                                  + inter_bytes), 4 << 20), 64 << 20))

    def const_spec(shape):
        # Constant block index -> Pallas keeps the block resident and does not
        # re-issue its DMA across batch tiles.
        # TODO(synk): at much larger hidden widths, single-buffer these with
        # pipeline_mode=pl.Buffered(1) (constant blocks gain nothing from
        # double-buffering) or switch to a K-tiled grid + VMEM accumulator so
        # the design still fits v7x's 64 MiB VMEM.
        return pl.BlockSpec(shape, lambda i: (0, 0))

    out = pl.pallas_call(
        mlp_kernel,
        out_shape=jax.ShapeDtypeStruct((B_pad, Op), out_dtype),
        grid=(grid_b,),
        in_specs=[
            pl.BlockSpec((tile_b, F), lambda i: (i, 0)),       # x tile
            const_spec((F, H1p)),   const_spec((1, H1p)),
            const_spec((H1p, H2p)), const_spec((1, H2p)),
            const_spec((H2p, H3p)), const_spec((1, H3p)),
            const_spec((H3p, Op)),  const_spec((1, Op)),
        ],
        out_specs=pl.BlockSpec((tile_b, Op), lambda i: (i, 0)),
        compiler_params=pltpu.CompilerParams(
            dimension_semantics=("parallel",),
            vmem_limit_bytes=vmem_limit),
        cost_estimate=cost,
    )(x_p, *arrays)

    if B_pad == B and Op == O:
        return out
    return out[:B, :O]   # strip batch padding + lane-padding columns


def init_params(key, n_feature, n_hidden, n_hidden1, n_hidden2, n_output):
    """Deterministic synthetic init (PyTorch-like uniform fan-in scaling)."""
    dims = [(n_feature, n_hidden), (n_hidden, n_hidden1),
            (n_hidden1, n_hidden2), (n_hidden2, n_output)]
    params = []
    for (fan_in, fan_out) in dims:
        key, kw, kb = jax.random.split(key, 3)
        bound = 1.0 / (fan_in ** 0.5)
        w = jax.random.uniform(kw, (fan_in, fan_out), jnp.float32,
                               minval=-bound, maxval=bound)
        b = jax.random.uniform(kb, (fan_out,), jnp.float32,
                               minval=-bound, maxval=bound)
        params.append((w, b))
    return params


def net2_reference(x, params):
    (w1, b1), (w2, b2), (w3, b3), (w4, b4) = params
    h = jnp.maximum(x @ w1 + b1, 0.0)
    h = jnp.maximum(h @ w2 + b2, 0.0)
    h = jnp.maximum(h @ w3 + b3, 0.0)
    return h @ w4 + b4


if __name__ == "__main__":
    # Net2(n_feature=32, n_hidden=64, n_hidden1=64, n_hidden2=32, n_output=16)
    # on a (batch, n_feature) input.  Batch 300 exercises the minimal-padding
    # ragged-batch path (300 -> 2 tiles of 152 rows, 304 padded rows total).
    n_feature, n_hidden, n_hidden1, n_hidden2, n_output = 32, 64, 64, 32, 16
    batch = 300

    key = jax.random.PRNGKey(0)
    key, kx = jax.random.split(key)
    x = jax.random.normal(kx, (batch, n_feature), jnp.float32)
    params = init_params(key, n_feature, n_hidden, n_hidden1, n_hidden2,
                         n_output)

    ref = net2_reference(x, params)

    # Default path: f32 params packed/padded ONCE outside the hot path.
    prepared = prepare_params(params)
    out = jax.block_until_ready(net2_forward(x, prepared))
    assert out.shape == (batch, n_output)
    assert jnp.allclose(out, ref, atol=1e-4, rtol=1e-4)

    # Explicit bf16 opt-in: params converted once here, never per forward call.
    prepared_bf16 = prepare_params(params, dtype=jnp.bfloat16)
    out_bf16 = jax.block_until_ready(net2_forward(x, prepared_bf16))
    assert out_bf16.shape == (batch, n_output)
    assert jnp.allclose(out_bf16, ref, atol=5e-2, rtol=5e-2)

    print("KERNEL_OK")
</pallas_src>

<mosaic_0001>
module attributes {stable_mosaic.version = 11 : i64} {
  func.func @mlp_kernel(%arg0: i32, %arg1: memref<152x32xf32, #tpu.memory_space<vmem>>, %arg2: memref<32x128xf32, #tpu.memory_space<vmem>>, %arg3: memref<1x128xf32, #tpu.memory_space<vmem>>, %arg4: memref<128x128xf32, #tpu.memory_space<vmem>>, %arg5: memref<1x128xf32, #tpu.memory_space<vmem>>, %arg6: memref<128x128xf32, #tpu.memory_space<vmem>>, %arg7: memref<1x128xf32, #tpu.memory_space<vmem>>, %arg8: memref<128x128xf32, #tpu.memory_space<vmem>>, %arg9: memref<1x128xf32, #tpu.memory_space<vmem>>, %arg10: memref<152x128xf32, #tpu.memory_space<vmem>>) attributes {dimension_semantics = [#tpu.dimension_semantics<parallel>], iteration_bounds = array<i64: 2>, scalar_prefetch = 0 : i64, scratch_operands = 0 : i64, tpu.core_type = #tpu.core_type<tc>, window_params = [{transform_indices = @transform_0, window_bounds = array<i64: 152, 32>}, {pipeline_mode = #tpu.pipeline_mode<synchronous>, transform_indices = @transform_1, window_bounds = array<i64: 32, 128>}, {pipeline_mode = #tpu.pipeline_mode<synchronous>, transform_indices = @transform_2, window_bounds = array<i64: 1, 128>}, {pipeline_mode = #tpu.pipeline_mode<synchronous>, transform_indices = @transform_3, window_bounds = array<i64: 128, 128>}, {pipeline_mode = #tpu.pipeline_mode<synchronous>, transform_indices = @transform_4, window_bounds = array<i64: 1, 128>}, {pipeline_mode = #tpu.pipeline_mode<synchronous>, transform_indices = @transform_5, window_bounds = array<i64: 128, 128>}, {pipeline_mode = #tpu.pipeline_mode<synchronous>, transform_indices = @transform_6, window_bounds = array<i64: 1, 128>}, {pipeline_mode = #tpu.pipeline_mode<synchronous>, transform_indices = @transform_7, window_bounds = array<i64: 128, 128>}, {pipeline_mode = #tpu.pipeline_mode<synchronous>, transform_indices = @transform_8, window_bounds = array<i64: 1, 128>}, {transform_indices = @transform_9, window_bounds = array<i64: 152, 128>}]} {
    %c0 = arith.constant 0 : index
    %c0_0 = arith.constant 0 : index
    %0 = vector.load %arg1[%c0, %c0_0] : memref<152x32xf32, #tpu.memory_space<vmem>>, vector<152x32xf32>
    %c0_1 = arith.constant 0 : index
    %c0_2 = arith.constant 0 : index
    %1 = vector.load %arg2[%c0_1, %c0_2] : memref<32x128xf32, #tpu.memory_space<vmem>>, vector<32x128xf32>
    %cst = arith.constant dense<0.000000e+00> : vector<152x128xf32>
    %2 = tpu.matmul %0, %1, %cst {dimension_numbers = #tpu.dot_dimension_numbers<[1], [0], [0], [1], [0, 0, 1, 1], [], []>} : vector<152x32xf32>, vector<32x128xf32>, vector<152x128xf32> -> vector<152x128xf32>
    %c0_3 = arith.constant 0 : index
    %c0_4 = arith.constant 0 : index
    %3 = vector.load %arg3[%c0_3, %c0_4] : memref<1x128xf32, #tpu.memory_space<vmem>>, vector<1x128xf32>
    %4 = vector.broadcast %3 : vector<1x128xf32> to vector<152x128xf32>
    %5 = arith.addf %2, %4 : vector<152x128xf32>
    %cst_5 = arith.constant 0.000000e+00 : f32
    %6 = vector.broadcast %cst_5 : f32 to vector<152x128xf32>
    %7 = arith.maximumf %5, %6 : vector<152x128xf32>
    %c0_6 = arith.constant 0 : index
    %c0_7 = arith.constant 0 : index
    %8 = vector.load %arg4[%c0_6, %c0_7] : memref<128x128xf32, #tpu.memory_space<vmem>>, vector<128x128xf32>
    %cst_8 = arith.constant dense<0.000000e+00> : vector<152x128xf32>
    %9 = tpu.matmul %7, %8, %cst_8 {dimension_numbers = #tpu.dot_dimension_numbers<[1], [0], [0], [1], [0, 0, 1, 1], [], []>} : vector<152x128xf32>, vector<128x128xf32>, vector<152x128xf32> -> vector<152x128xf32>
    %c0_9 = arith.constant 0 : index
    %c0_10 = arith.constant 0 : index
    %10 = vector.load %arg5[%c0_9, %c0_10] : memref<1x128xf32, #tpu.memory_space<vmem>>, vector<1x128xf32>
    %11 = vector.broadcast %10 : vector<1x128xf32> to vector<152x128xf32>
    %12 = arith.addf %9, %11 : vector<152x128xf32>
    %cst_11 = arith.constant 0.000000e+00 : f32
    %13 = vector.broadcast %cst_11 : f32 to vector<152x128xf32>
    %14 = arith.maximumf %12, %13 : vector<152x128xf32>
    %c0_12 = arith.constant 0 : index
    %c0_13 = arith.constant 0 : index
    %15 = vector.load %arg6[%c0_12, %c0_13] : memref<128x128xf32, #tpu.memory_space<vmem>>, vector<128x128xf32>
    %cst_14 = arith.constant dense<0.000000e+00> : vector<152x128xf32>
    %16 = tpu.matmul %14, %15, %cst_14 {dimension_numbers = #tpu.dot_dimension_numbers<[1], [0], [0], [1], [0, 0, 1, 1], [], []>} : vector<152x128xf32>, vector<128x128xf32>, vector<152x128xf32> -> vector<152x128xf32>
    %c0_15 = arith.constant 0 : index
    %c0_16 = arith.constant 0 : index
    %17 = vector.load %arg7[%c0_15, %c0_16] : memref<1x128xf32, #tpu.memory_space<vmem>>, vector<1x128xf32>
    %18 = vector.broadcast %17 : vector<1x128xf32> to vector<152x128xf32>
    %19 = arith.addf %16, %18 : vector<152x128xf32>
    %cst_17 = arith.constant 0.000000e+00 : f32
    %20 = vector.broadcast %cst_17 : f32 to vector<152x128xf32>
    %21 = arith.maximumf %19, %20 : vector<152x128xf32>
    %c0_18 = arith.constant 0 : index
    %c0_19 = arith.constant 0 : index
    %22 = vector.load %arg8[%c0_18, %c0_19] : memref<128x128xf32, #tpu.memory_space<vmem>>, vector<128x128xf32>
    %cst_20 = arith.constant dense<0.000000e+00> : vector<152x128xf32>
    %23 = tpu.matmul %21, %22, %cst_20 {dimension_numbers = #tpu.dot_dimension_numbers<[1], [0], [0], [1], [0, 0, 1, 1], [], []>} : vector<152x128xf32>, vector<128x128xf32>, vector<152x128xf32> -> vector<152x128xf32>
    %c0_21 = arith.constant 0 : index
    %c0_22 = arith.constant 0 : index
    %24 = vector.load %arg9[%c0_21, %c0_22] : memref<1x128xf32, #tpu.memory_space<vmem>>, vector<1x128xf32>
    %25 = vector.broadcast %24 : vector<1x128xf32> to vector<152x128xf32>
    %26 = arith.addf %23, %25 : vector<152x128xf32>
    %c0_23 = arith.constant 0 : index
    %c0_24 = arith.constant 0 : index
    %27 = vector.load %arg10[%c0_23, %c0_24] : memref<152x128xf32, #tpu.memory_space<vmem>>, vector<152x128xf32>
    tpu.vector_store %arg10[%c0_23, %c0_24], %26 {strides = array<i32>} : memref<152x128xf32, #tpu.memory_space<vmem>>, vector<152x128xf32>,
    return
  }
  func.func @transform_0(%arg0: i32) -> (i32, i32) {
    %c0_i32 = arith.constant 0 : i32
    %c0_i32_0 = arith.constant 0 : i32
    return %arg0, %c0_i32 : i32, i32
  }
  func.func @transform_1(%arg0: i32) -> (i32, i32) {
    %c0_i32 = arith.constant 0 : i32
    %c0_i32_0 = arith.constant 0 : i32
    %c0_i32_1 = arith.constant 0 : i32
    return %c0_i32, %c0_i32_0 : i32, i32
  }
  func.func @transform_2(%arg0: i32) -> (i32, i32) {
    %c0_i32 = arith.constant 0 : i32
    %c0_i32_0 = arith.constant 0 : i32
    %c0_i32_1 = arith.constant 0 : i32
    return %c0_i32, %c0_i32_0 : i32, i32
  }
  func.func @transform_3(%arg0: i32) -> (i32, i32) {
    %c0_i32 = arith.constant 0 : i32
    %c0_i32_0 = arith.constant 0 : i32
    %c0_i32_1 = arith.constant 0 : i32
    return %c0_i32, %c0_i32_0 : i32, i32
  }
  func.func @transform_4(%arg0: i32) -> (i32, i32) {
    %c0_i32 = arith.constant 0 : i32
    %c0_i32_0 = arith.constant 0 : i32
    %c0_i32_1 = arith.constant 0 : i32
    return %c0_i32, %c0_i32_0 : i32, i32
  }
  func.func @transform_5(%arg0: i32) -> (i32, i32) {
    %c0_i32 = arith.constant 0 : i32
    %c0_i32_0 = arith.constant 0 : i32
    %c0_i32_1 = arith.constant 0 : i32
    return %c0_i32, %c0_i32_0 : i32, i32
  }
  func.func @transform_6(%arg0: i32) -> (i32, i32) {
    %c0_i32 = arith.constant 0 : i32
    %c0_i32_0 = arith.constant 0 : i32
    %c0_i32_1 = arith.constant 0 : i32
    return %c0_i32, %c0_i32_0 : i32, i32
  }
  func.func @transform_7(%arg0: i32) -> (i32, i32) {
    %c0_i32 = arith.constant 0 : i32
    %c0_i32_0 = arith.constant 0 : i32
    %c0_i32_1 = arith.constant 0 : i32
    return %c0_i32, %c0_i32_0 : i32, i32
  }
  func.func @transform_8(%arg0: i32) -> (i32, i32) {
    %c0_i32 = arith.constant 0 : i32
    %c0_i32_0 = arith.constant 0 : i32
    %c0_i32_1 = arith.constant 0 : i32
    return %c0_i32, %c0_i32_0 : i32, i32
  }
  func.func @transform_9(%arg0: i32) -> (i32, i32) {
    %c0_i32 = arith.constant 0 : i32
    %c0_i32_0 = arith.constant 0 : i32
    return %arg0, %c0_i32 : i32, i32
  }
}

</mosaic_0001>

<bundles_post_ra>
// kernel: tpu_custom_call.1
= control target key start
LH: loop header
LB: loop body
LE: loop exit
PB: predicated region body
PF: predicated region fallthrough
CT: control target
= control target key end

     0   :  { %14 = vsyncpa [#allocation3], 0  ;;  %s2708_s0 = inlined_call_operand.vmem [shape: f32[304,32], index: 0, kind: input, shape index: {}]   ;;  %s2709_s1 = inlined_call_operand.hbm [shape: f32[32,128], index: 1, kind: input, shape index: {}]   ;;  %s2710_s2 = inlined_call_operand.vmem [shape: f32[1,128], index: 2, kind: input, shape index: {}]   ;;  %s2711_s3 = inlined_call_operand.vmem [shape: f32[128,128], index: 3, kind: input, shape index: {}]   ;;  %s2712_s4 = inlined_call_operand.vmem [shape: f32[1,128], index: 4, kind: input, shape index: {}]   ;;  %s2713_s5 = inlined_call_operand.vmem [shape: f32[128,128], index: 5, kind: input, shape index: {}]   ;;  %s2714_s6 = inlined_call_operand.vmem [shape: f32[1,128], index: 6, kind: input, shape index: {}]   ;;  %s2715_s7 = inlined_call_operand.vmem [shape: f32[128,128], index: 7, kind: input, shape index: {}]   ;;  %s2716_s8 = inlined_call_operand.vmem [shape: f32[1,128], index: 8, kind: input, shape index: {}]   ;;  %s2717_s9 = inlined_call_operand.hbm [shape: f32[304,128], index: 9, kind: output, shape index: {}]  }
   0x1   :  { %15 = vsyncpa [#allocation4], 0 }
   0x2   :  { %17 = vsyncpa [#allocation4 + $0x1], 0  ;;  %s2043_s30 = smov 0   ;;  %s2045_s10 = smov 0  }
   0x3   :  { %s2047_s11 = smov 0   ;;  %s2049_s12 = smov 0  }
   0x4 LB: > { %s2064_s13 = sadd.s32 4294967295, %s1983_s12   ;;  %s1310_s14 = sadd.s32 4294967294, %s1983_s12   ;;  %s1983_s12 = sphi %s2049_s12, %s2725_s12   ;;  %s1979_s11 = sphi %s2047_s11, %s2724_s11   ;;  %s1975_s10 = sphi %s2045_s10, %s2723_s10   ;;  %s1971_s30 = sphi %s2043_s30, %s2722_s30  }
   0x5   : > { %s2068_s15 = sadd.s32 1, %s1983_s12   ;;  %s224_s16 = sadd.s32 1, %s1979_s11 }
   0x6   : > { %s221_s17 = ssub.s32 %s1983_s12, %s2068_s15  ;;  %p234_p0 = scmp.ne.s32.totalorder %s1979_s11, %s1975_s10 }
   0x7   : > { %p222_p1 = scmp.eq.s32.totalorder %s221_s17, 0  ;;  %p235_p2 = scmp.eq.s32.totalorder %s2064_s13, 1 }
   0x8   : > { %p240_p3 = scmp.ne.s32.totalorder %s1975_s10, %s1971_s30  ;;  %p241_p4 = scmp.eq.s32.totalorder %s1310_s14, 1 }
   0x9   : > { %s2079_s18 = scalar_select %p222_p1, %s1979_s11, %s224_s16  }
   0xa   : > { %p2081_p5 = por %p235_p2, %p234_p0  ;;  %p2085_p6 = por %p241_p4, %p240_p3 }
   0xb   : > { %p1311_p7 = scmp.ge.s32.totalorder %s1983_s12, 1  ;;  %p248_p8 = scmp.lt.s32.totalorder %s1983_s12, 3 }
   0xc   : > { %s2719_s20 = scalar_select %p2085_p6, 1, 0 }
   0xd   : > { %p1851_p9 = scmp.eq.s32.totalorder %s2064_s13, 0  ;;  %p2092_p10 = pnand %p1311_p7, %p248_p8 }
   0xe   : > { %s1985_s22 = smov [#allocation2]  }
   0xf   : > { %s260_s23 = sshll.u32 %s1985_s22, 4  ;;  %p1843_p11 = pneg %p2092_p10  ;;  %s261_s23 = int_to_ptr.vmem [resolvable:$true] %s260_s23 }
  0x10   : > { %s1904_s24 = scalar_lea.vmem %s261_s23, 512  ;;  %p1912_p3 = scmp.lt.s32.totalorder %s261_s23, %s261_s23 }
  0x11   : > { %p1844_p12 = pnand %p1851_p9, %p1843_p11  ;;  %p1905_p0 = scmp.ne.s32.totalorder %s261_s23, %s1904_s24 }
  0x12   : > { %p1913_p4 = scmp.lt.s32.totalorder %s1904_s24, %s1904_s24 }
  0x13   : > { %p1895_p13 = pneg %p1844_p12 }
  0x14   : > { %p1914_p6 = por %p1913_p4, %p1912_p3 }
  0x15   : > { %p1907_p1 = pnand %p1905_p0, %p1895_p13 }
  0x17   : > { %p1908_p2 = pneg %p1907_p1 }
  0x19   : > { %p1915_p7 = pnand %p1914_p6, %p1908_p2 }
  0x1b   : > { %1918 = shalt.err (!%p1915_p7)
}
  0x1c   : > { %s1986_s25 = smov 128   ;;  %s1987_s26 = smov 8  }
  0x1d   : > { %1846 = dma.hbm_to_vmem [thread:$0]  (!%p1844_p12), %s2709_s1, 512, %s261_s23, [#allocation3], %s1986_s25, %s1986_s25, %s1987_s26  }
  0x1e   : > { %306 = sbr.rel (%p2092_p10) target bundleno = 918 (0x396), region = 56 }
  0x23   : > { %1962 = dma.done.wait (%p1851_p9), [#allocation3], 512  }
  0x24   : > { %1964 = vsyncadd (%p1851_p9), [#allocation3], 4294966784  ;;  %s342_s29 = smul.u32 19, %s2064_s13  ;;  %v1988_v0 = vmov 0.0   ;;  %vm1989_vm0 = vmmov 0   ;;  %v371_v1 = vld [vmem:[#allocation2 + $0x18] sm:$0xff] }
  0x25   : > { %1472 = vmatprep.subr.mxu0 %v1988_v0  ;;  %1480 = vmatprep.mubr.msk.f32.mxu0 %vm1989_vm0, %v1988_v0  ;;  %v370_v2 = vld [vmem:[#allocation2 + $0x10] sm:$0xff]  ;;  %v369_v3 = vld [vmem:[#allocation2 + $0x8] sm:$0xff]  ;;  %v368_v4 = vld [vmem:[#allocation2] sm:$0xff]  ;;  %vm379_vm1 = vcmask 261120   ;;  %s1343_s24 = smul.u32 2432, %s2064_s13 }
  0x26   : > { %p343_p6 = scmp.lt.s32.totalorder %s342_s29, 37  ;;  %1537 = vmatprep.subr.mxu1 %v1988_v0  ;;  %1569 = vmatprep.mubr.msk.f32.mxu1 %vm1989_vm0, %v1988_v0  ;;  %v631_v6 = vld [vmem:[%s2711_s3 + $0x78] sm:$0xff]  ;;  %v630_v7 = vld [vmem:[%s2711_s3 + $0x70] sm:$0xff]  ;;  %v629_v9 = vld [vmem:[%s2711_s3 + $0x68] sm:$0xff] }
  0x27   : > { %1473 = vmatpush3.msra.mxu0 %v371_v1  ;;  %1538 = vmatpush3.msra.mxu1 %v631_v6  ;;  %v628_v10 = vld [vmem:[%s2711_s3 + $0x60] sm:$0xff]  ;;  %v627_v12 = vld [vmem:[%s2711_s3 + $0x58] sm:$0xff]  ;;  %v626_v13 = vld [vmem:[%s2711_s3 + $0x50] sm:$0xff]  ;;  %s2660_s27 = scalar_lea.hbm %s2717_s9, %s1343_s24 }
  0x28   : > { %s2727_s29 = smov (!%p343_p6, %s342_s29), 37  ;;  %1474 = vmatprep.subr.mxu0 %v1988_v0  ;;  %1539 = vmatprep.subr.mxu1 %v1988_v0  ;;  %v625_v15 = vld [vmem:[%s2711_s3 + $0x48] sm:$0xff]  ;;  %v624_v16 = vld [vmem:[%s2711_s3 + $0x40] sm:$0xff]  ;;  %v623_v18 = vld [vmem:[%s2711_s3 + $0x38] sm:$0xff] }
  0x29   : > { %s1316_s14 = sshll.u32 %s2727_s29, 3  ;;  %1475 = vmatpush3.msra.mxu0 %v370_v2  ;;  %1540 = vmatpush3.msra.mxu1 %v630_v7  ;;  %v622_v19 = vld [vmem:[%s2711_s3 + $0x30] sm:$0xff]  ;;  %v621_v21 = vld [vmem:[%s2711_s3 + $0x28] sm:$0xff]  ;;  %v620_v22 = vld [vmem:[%s2711_s3 + $0x20] sm:$0xff]  ;;  %s1990_s29 = smov [#allocation5]  }
  0x2a   : > { %s2120_s21 = scalar_lea.vmem %s2708_s0, %s1316_s14  ;;  %1476 = vmatprep.subr.mxu0 %v1988_v0  ;;  %1541 = vmatprep.subr.mxu1 %v1988_v0  ;;  %v619_v24 = vld [vmem:[%s2711_s3 + $0x18] sm:$0xff]  ;;  %v618_v35 = vld [vmem:[%s2711_s3 + $0x10] sm:$0xff]  ;;  %v617_v37 = vld [vmem:[%s2711_s3 + $0x8] sm:$0xff]  ;;  %s339_s14 = sand.u32 1, %s1975_s10  }
  0x2b   : > { %1477 = vmatpush3.msra.mxu0 %v369_v3  ;;  %v349_v5 = vld [vmem:[%s2120_s21] sm:$0xff]  ;;  %v350_v8 = vld [vmem:[%s2120_s21 + $0x8] sm:$0xff]  ;;  %1542 = vmatpush3.msra.mxu1 %v629_v9  ;;  %v351_v11 = vld [vmem:[%s2120_s21 + $0x10] sm:$0xff]  ;;  %s1836_s16 = smul.u32 152, %s339_s14  ;;  %s2668_s13 = scalar_lea.sflag [#allocation4], %s339_s14 }
  0x2c   : > { %1478 = vmatprep.subr.mxu0 %v1988_v0  ;;  %1543 = vmatprep.subr.mxu1 %v1988_v0  ;;  %v352_v14 = vld [vmem:[%s2120_s21 + $0x18] sm:$0xff]  ;;  %v353_v17 = vld [vmem:[%s2120_s21 + $0x20] sm:$0xff]  ;;  %v354_v20 = vld [vmem:[%s2120_s21 + $0x28] sm:$0xff] }
  0x2d   : > { %1479 = vmatpush3.msra.mxu0 %v368_v4  ;;  %1544 = vmatpush3.msra.mxu1 %v628_v10  ;;  %v355_v23 = vld [vmem:[%s2120_s21 + $0x30] sm:$0xff]  ;;  %v356_v25 = vld [vmem:[%s2120_s21 + $0x38] sm:$0xff]  ;;  %v357_v26 = vld [vmem:[%s2120_s21 + $0x40] sm:$0xff]  ;;  %s2618_s23 = scalar_lea.vmem [#allocation5], %s1836_s16  ;;  %s1923_s16 = sshll.u32 %s1990_s29, 4  ;;  %s1924_s16 = int_to_ptr.vmem [resolvable:$false] %s1923_s16 }
  0x2e   : > { %1481 = vmatmul.mubr.msk.f32.vlgmr.msra.gmra.mxu0 %vm379_vm1, %v349_v5  ;;  %1626 = vmatprep.subr.mxu0 %v1988_v0  ;;  %v358_v27 = vld [vmem:[%s2120_s21 + $0x48] sm:$0xff]  ;;  %v359_v28 = vld [vmem:[%s2120_s21 + $0x50] sm:$0xff]  ;;  %v360_v29 = vld [vmem:[%s2120_s21 + $0x58] sm:$0xff]  ;;  %s1236_s25 = sshll.u32 %s2618_s23, 4  ;;  %s1925_s17 = scalar_lea.vmem %s1924_s16, 4864  ;;  %s2662_s25 = int_to_ptr.vmem [resolvable:$true] %s1236_s25 }
  0x2f   : > { %1483 = vmatprep.mubr.msk.f32.mxu0 %vm1989_vm0, %v1988_v0  ;;  %1545 = vmatprep.subr.mxu1 %v1988_v0  ;;  %v361_v30 = vld [vmem:[%s2120_s21 + $0x60] sm:$0xff]  ;;  %v362_v31 = vld [vmem:[%s2120_s21 + $0x68] sm:$0xff]  ;;  %v363_v32 = vld [vmem:[%s2120_s21 + $0x70] sm:$0xff]  ;;  %s1919_s28 = scalar_lea.vmem %s2662_s25, 2432  ;;  %p1926_p11 = scmp.lt.s32.totalorder %s2662_s25, %s1924_s16 }
  0x30   : > { %1546 = vmatpush3.msra.mxu1 %v627_v12  ;;  %v364_v33 = vld [vmem:[%s2120_s21 + $0x78] sm:$0xff]  ;;  %v365_v34 = vld [vmem:[%s2120_s21 + $0x80] sm:$0xff]  ;;  %v366_v36 = vld [vmem:[%s2120_s21 + $0x88] sm:$0xff]  ;;  %p1920_p8 = scmp.ne.s32.totalorder %s2662_s25, %s1919_s28  ;;  %p1927_p12 = scmp.lt.s32.totalorder %s1925_s17, %s1919_s28 }
  0x31   : > { %1547 = vmatprep.subr.mxu1 %v1988_v0  ;;  %v616_v38 = vld [vmem:[%s2711_s3] sm:$0xff]  ;;  %v367_v39 = vld [vmem:[%s2120_s21 + $0x90] sm:$0xff]  ;;  %v833_v40 = vld [vmem:[%s2713_s5 + $0x78] sm:$0xff] }
  0x32   : > { %1484 = vmatmul.mubr.msk.f32.gmra.mxu0 %vm379_vm1, %v350_v8  ;;  %1548 = vmatpush3.msra.mxu1 %v626_v13  ;;  %v832_v41 = vld [vmem:[%s2713_s5 + $0x70] sm:$0xff]  ;;  %v831_v42 = vld [vmem:[%s2713_s5 + $0x68] sm:$0xff]  ;;  %v830_v43 = vld [vmem:[%s2713_s5 + $0x60] sm:$0xff]  ;;  %p1921_p9 = pnand %p1920_p8, %p2081_p5  ;;  %p1928_p13 = por %p1927_p12, %p1926_p11 }
  0x33   : > { %1486 = vmatprep.mubr.msk.f32.mxu0 %vm1989_vm0, %v1988_v0  ;;  %1549 = vmatprep.subr.mxu1 %v1988_v0  ;;  %v829_v44 = vld [vmem:[%s2713_s5 + $0x58] sm:$0xff]  ;;  %v828_v45 = vld [vmem:[%s2713_s5 + $0x50] sm:$0xff]  ;;  %v827_v46 = vld [vmem:[%s2713_s5 + $0x48] sm:$0xff] }
  0x34   : > { %1550 = vmatpush3.msra.mxu1 %v625_v15  ;;  %1627 = vmatpush3.msra.mxu0 %v833_v40  ;;  %v826_v47 = vld [vmem:[%s2713_s5 + $0x40] sm:$0xff]  ;;  %v825_v48 = vld [vmem:[%s2713_s5 + $0x38] sm:$0xff]  ;;  %v824_v49 = vld [vmem:[%s2713_s5 + $0x30] sm:$0xff]  ;;  %p1922_p10 = pneg %p1921_p9 }
  0x35   : > { %1551 = vmatprep.subr.mxu1 %v1988_v0  ;;  %1628 = vmatprep.subr.mxu0 %v1988_v0  ;;  %v823_v50 = vld [vmem:[%s2713_s5 + $0x28] sm:$0xff]  ;;  %v822_v51 = vld [vmem:[%s2713_s5 + $0x20] sm:$0xff]  ;;  %v821_v52 = vld [vmem:[%s2713_s5 + $0x18] sm:$0xff] }
  0x36   : > { %1487 = vmatmul.mubr.msk.f32.gmra.mxu0 %vm379_vm1, %v351_v11  ;;  %1552 = vmatpush3.msra.mxu1 %v624_v16  ;;  %v820_v53 = vld [vmem:[%s2713_s5 + $0x10] sm:$0xff]  ;;  %v819_v54 = vld [vmem:[%s2713_s5 + $0x8] sm:$0xff]  ;;  %v2328_v55 = vld [vmem:[%s2710_s2] ss:$0 sm:$0xff]  ;;  %p1929_p0 = pnand %p1928_p13, %p1922_p10 }
  0x37   : > { %1489 = vmatprep.mubr.msk.f32.mxu0 %vm1989_vm0, %v1988_v0  ;;  %1553 = vmatprep.subr.mxu1 %v1988_v0 }
  0x38   : > { %1554 = vmatpush3.msra.mxu1 %v623_v18  ;;  %1629 = vmatpush3.msra.mxu0 %v832_v41 }
  0x39   : > { %1555 = vmatprep.subr.mxu1 %v1988_v0  ;;  %1630 = vmatprep.subr.mxu0 %v1988_v0 }
  0x3a   : > { %1490 = vmatmul.mubr.msk.f32.gmra.mxu0 %vm379_vm1, %v352_v14  ;;  %1556 = vmatpush3.msra.mxu1 %v622_v19 }
  0x3b   : > { %1492 = vmatprep.mubr.msk.f32.mxu0 %vm1989_vm0, %v1988_v0  ;;  %1557 = vmatprep.subr.mxu1 %v1988_v0 }
  0x3c   : > { %1558 = vmatpush3.msra.mxu1 %v621_v21  ;;  %1631 = vmatpush3.msra.mxu0 %v831_v42 }
  0x3d   : > { %1559 = vmatprep.subr.mxu1 %v1988_v0  ;;  %1632 = vmatprep.subr.mxu0 %v1988_v0 }
  0x3e   : > { %1493 = vmatmul.mubr.msk.f32.gmra.mxu0 %vm379_vm1, %v353_v17  ;;  %1560 = vmatpush3.msra.mxu1 %v620_v22 }
  0x3f   : > { %1495 = vmatprep.mubr.msk.f32.mxu0 %vm1989_vm0, %v1988_v0  ;;  %1561 = vmatprep.subr.mxu1 %v1988_v0 }
  0x40   : > { %1562 = vmatpush3.msra.mxu1 %v619_v24  ;;  %1633 = vmatpush3.msra.mxu0 %v830_v43 }
  0x41   : > { %1563 = vmatprep.subr.mxu1 %v1988_v0  ;;  %1634 = vmatprep.subr.mxu0 %v1988_v0 }
  0x42   : > { %1496 = vmatmul.mubr.msk.f32.gmra.mxu0 %vm379_vm1, %v354_v20  ;;  %1564 = vmatpush3.msra.mxu1 %v618_v35 }
  0x43   : > { %1498 = vmatprep.mubr.msk.f32.mxu0 %vm1989_vm0, %v1988_v0  ;;  %1565 = vmatprep.subr.mxu1 %v1988_v0 }
  0x44   : > { %1566 = vmatpush3.msra.mxu1 %v617_v37  ;;  %1635 = vmatpush3.msra.mxu0 %v829_v44 }
  0x45   : > { %1567 = vmatprep.subr.mxu1 %v1988_v0  ;;  %1636 = vmatprep.subr.mxu0 %v1988_v0 }
  0x46   : > { %1499 = vmatmul.mubr.msk.f32.gmra.mxu0 %vm379_vm1, %v355_v23  ;;  %1568 = vmatpush3.msra.mxu1 %v616_v38 }
  0x47   : > { %1501 = vmatprep.mubr.msk.f32.mxu0 %vm1989_vm0, %v1988_v0  ;;  %1804 = vmatprep.subr.mxu1 %v1988_v0 }
  0x48   : > { %1637 = vmatpush3.msra.mxu0 %v828_v45 }
  0x49   : > { %1638 = vmatprep.subr.mxu0 %v1988_v0 }
  0x4a   : > { %1502 = vmatmul.mubr.msk.f32.gmra.mxu0 %vm379_vm1, %v356_v25 }
  0x4b   : > { %1504 = vmatprep.mubr.msk.f32.mxu0 %vm1989_vm0, %v1988_v0  ;;  %1639 = vmatpush3.msra.mxu0 %v827_v46 }
  0x4c   : > { %1640 = vmatprep.subr.mxu0 %v1988_v0 }
  0x4d   : > { %1641 = vmatpush3.msra.mxu0 %v826_v47 }
  0x4e   : > { %1505 = vmatmul.mubr.msk.f32.gmra.mxu0 %vm379_vm1, %v357_v26  ;;  %1642 = vmatprep.subr.mxu0 %v1988_v0 }
  0x4f   : > { %1507 = vmatprep.mubr.msk.f32.mxu0 %vm1989_vm0, %v1988_v0  ;;  %1643 = vmatpush3.msra.mxu0 %v825_v48 }
  0x50   : > { %1644 = vmatprep.subr.mxu0 %v1988_v0 }
  0x51   : > { %1645 = vmatpush3.msra.mxu0 %v824_v49 }
  0x52   : > { %1508 = vmatmul.mubr.msk.f32.gmra.mxu0 %vm379_vm1, %v358_v27  ;;  %1646 = vmatprep.subr.mxu0 %v1988_v0 }
  0x53   : > { %1510 = vmatprep.mubr.msk.f32.mxu0 %vm1989_vm0, %v1988_v0  ;;  %1647 = vmatpush3.msra.mxu0 %v823_v50 }
  0x54   : > { %1648 = vmatprep.subr.mxu0 %v1988_v0 }
  0x55   : > { %1649 = vmatpush3.msra.mxu0 %v822_v51 }
  0x56   : > { %1511 = vmatmul.mubr.msk.f32.gmra.mxu0 %vm379_vm1, %v359_v28  ;;  %1650 = vmatprep.subr.mxu0 %v1988_v0 }
  0x57   : > { %1513 = vmatprep.mubr.msk.f32.mxu0 %vm1989_vm0, %v1988_v0  ;;  %1651 = vmatpush3.msra.mxu0 %v821_v52 }
  0x58   : > { %1652 = vmatprep.subr.mxu0 %v1988_v0 }
  0x59   : > { %1653 = vmatpush3.msra.mxu0 %v820_v53 }
  0x5a   : > { %1514 = vmatmul.mubr.msk.f32.gmra.mxu0 %vm379_vm1, %v360_v29  ;;  %1654 = vmatprep.subr.mxu0 %v1988_v0 }
  0x5b   : > { %1516 = vmatprep.mubr.msk.f32.mxu0 %vm1989_vm0, %v1988_v0  ;;  %1655 = vmatpush3.msra.mxu0 %v819_v54 }
  0x5c   : > { %1656 = vmatprep.subr.mxu0 %v1988_v0 }
  0x5e   : > { %1517 = vmatmul.mubr.msk.f32.gmra.mxu0 %vm379_vm1, %v361_v30 }
  0x5f   : > { %1519 = vmatprep.mubr.msk.f32.mxu0 %vm1989_vm0, %v1988_v0 }
  0x62   : > { %1520 = vmatmul.mubr.msk.f32.gmra.mxu0 %vm379_vm1, %v362_v31 }
  0x63   : > { %1522 = vmatprep.mubr.msk.f32.mxu0 %vm1989_vm0, %v1988_v0 }
  0x66   : > { %1523 = vmatmul.mubr.msk.f32.gmra.mxu0 %vm379_vm1, %v363_v32 }
  0x67   : > { %1525 = vmatprep.mubr.msk.f32.mxu0 %vm1989_vm0, %v1988_v0 }
  0x6a   : > { %1526 = vmatmul.mubr.msk.f32.gmra.mxu0 %vm379_vm1, %v364_v33 }
  0x6b   : > { %1528 = vmatprep.mubr.msk.f32.mxu0 %vm1989_vm0, %v1988_v0 }
  0x6e   : > { %1529 = vmatmul.mubr.msk.f32.gmra.mxu0 %vm379_vm1, %v365_v34 }
  0x6f   : > { %1531 = vmatprep.mubr.msk.f32.mxu0 %vm1989_vm0, %v1988_v0 }
  0x72   : > { %1532 = vmatmul.mubr.msk.f32.gmra.mxu0 %vm379_vm1, %v366_v36 }
  0x73   : > { %1534 = vmatprep.mubr.msk.f32.mxu0 %vm1989_vm0, %v1988_v0 }
  0x76   : > { %1535 = vmatmul.mubr.msk.f32.gmra.mxu0 %vm379_vm1, %v367_v39 }
  0x77   : > { %1658 = vmatprep.mubr.msk.f32.mxu0 %vm1989_vm0, %v1988_v0 }
  0xee   : > { %v503_v56 = vpop.f32.mrf.mxu0 }
  0xef   : > { %v504_v57 = vadd.f32 %v2328_v55, %v503_v56 }
  0xf0   : > { %v1482_v58 = vpop.f32.mrf.mxu0 }
  0xf1   : > { %v597_v59 = vmax.f32 %v504_v57, 0.0 }
  0xf2   : > { %v508_v60 = vpop.f32.mrf.mxu0 }
  0xf3   : > { %v509_v61 = vadd.f32 %v2328_v55, %v508_v60  ;;  %1570 = vmatmul.mubr.f32.vlgmr.msra.gmra.mxu1 %v597_v59 }
  0xf4   : > { %v1485_v62 = vpop.f32.mrf.mxu0  ;;  %1572 = vmatprep.mubr.msk.f32.mxu1 %vm1989_vm0, %v1988_v0 }
  0xf5   : > { %v598_v63 = vmax.f32 %v509_v61, 0.0 }
  0xf6   : > { %v513_v1 = vpop.f32.mrf.mxu0 }
  0xf7   : > { %v514_v2 = vadd.f32 %v2328_v55, %v513_v1  ;;  %1573 = vmatmul.mubr.f32.gmra.mxu1 %v598_v63 }
  0xf8   : > { %v1488_v3 = vpop.f32.mrf.mxu0  ;;  %1575 = vmatprep.mubr.msk.f32.mxu1 %vm1989_vm0, %v1988_v0 }
  0xf9   : > { %v599_v4 = vmax.f32 %v514_v2, 0.0 }
  0xfa   : > { %v518_v5 = vpop.f32.mrf.mxu0 }
  0xfb   : > { %v519_v6 = vadd.f32 %v2328_v55, %v518_v5  ;;  %1576 = vmatmul.mubr.f32.gmra.mxu1 %v599_v4  ;;  %v818_v4 = vld [vmem:[%s2713_s5] sm:$0xff] }
  0xfc   : > { %v1491_v7 = vpop.f32.mrf.mxu0  ;;  %1578 = vmatprep.mubr.msk.f32.mxu1 %vm1989_vm0, %v1988_v0  ;;  %1657 = vmatpush3.msra.mxu0 %v818_v4 }
  0xfd   : > { %v600_v8 = vmax.f32 %v519_v6, 0.0  ;;  %1715 = vmatprep.subr.mxu0 %v1988_v0 }
  0xfe   : > { %v523_v9 = vpop.f32.mrf.mxu0 }
  0xff   : > { %v524_v10 = vadd.f32 %v2328_v55, %v523_v9  ;;  %1579 = vmatmul.mubr.f32.gmra.mxu1 %v600_v8  ;;  %v1035_v8 = vld [vmem:[%s2715_s7 + $0x78] sm:$0xff]  ;;  %v1033_v9 = vld [vmem:[%s2715_s7 + $0x68] sm:$0xff] }
 0x100   : > { %v1494_v11 = vpop.f32.mrf.mxu0  ;;  %1581 = vmatprep.mubr.msk.f32.mxu1 %vm1989_vm0, %v1988_v0  ;;  %1820 = vmatpush3.msra.mxu1 %v1035_v8 }
 0x101   : > { %v601_v12 = vmax.f32 %v524_v10, 0.0  ;;  %1805 = vmatprep.subr.mxu1 %v1988_v0  ;;  %v1032_v10 = vld [vmem:[%s2715_s7 + $0x60] sm:$0xff]  ;;  %v1031_v11 = vld [vmem:[%s2715_s7 + $0x58] sm:$0xff] }
 0x102   : > { %v528_v13 = vpop.f32.mrf.mxu0 }
 0x103   : > { %v529_v14 = vadd.f32 %v2328_v55, %v528_v13  ;;  %1582 = vmatmul.mubr.f32.gmra.mxu1 %v601_v12  ;;  %v1030_v12 = vld [vmem:[%s2715_s7 + $0x50] sm:$0xff]  ;;  %v1029_v13 = vld [vmem:[%s2715_s7 + $0x48] sm:$0xff] }
 0x104   : > { %v1497_v15 = vpop.f32.mrf.mxu0  ;;  %1584 = vmatprep.mubr.msk.f32.mxu1 %vm1989_vm0, %v1988_v0 }
 0x105   : > { %v602_v16 = vmax.f32 %v529_v14, 0.0  ;;  %v1028_v14 = vld [vmem:[%s2715_s7 + $0x40] sm:$0xff]  ;;  %v2426_v15 = vld [vmem:[%s2715_s7 + $0x38] sm:$0xff] }
 0x106   : > { %v533_v17 = vpop.f32.mrf.mxu0 }
 0x107   : > { %v534_v18 = vadd.f32 %v2328_v55, %v533_v17  ;;  %1585 = vmatmul.mubr.f32.gmra.mxu1 %v602_v16  ;;  %v2433_v16 = vld [vmem:[%s2715_s7 + $0x30] sm:$0xff]  ;;  %v2440_v17 = vld [vmem:[%s2715_s7 + $0x28] sm:$0xff] }
 0x108   : > { %v1500_v19 = vpop.f32.mrf.mxu0  ;;  %1587 = vmatprep.mubr.msk.f32.mxu1 %vm1989_vm0, %v1988_v0 }
 0x109   : > { %v603_v20 = vmax.f32 %v534_v18, 0.0  ;;  %v2447_v18 = vld [vmem:[%s2715_s7 + $0x20] sm:$0xff]  ;;  %v2454_v19 = vld [vmem:[%s2715_s7 + $0x18] sm:$0xff] }
 0x10a   : > { %v538_v21 = vpop.f32.mrf.mxu0 }
 0x10b   : > { %v539_v22 = vadd.f32 %v2328_v55, %v538_v21  ;;  %1588 = vmatmul.mubr.f32.gmra.mxu1 %v603_v20  ;;  %v2461_v20 = vld [vmem:[%s2712_s4] ss:$0 sm:$0xff] }
 0x10c   : > { %v1503_v23 = vpop.f32.mrf.mxu0  ;;  %1590 = vmatprep.mubr.msk.f32.mxu1 %vm1989_vm0, %v1988_v0 }
 0x10d   : > { %v604_v24 = vmax.f32 %v539_v22, 0.0 }
 0x10e   : > { %v543_v25 = vpop.f32.mrf.mxu0 }
 0x10f   : > { %v544_v26 = vadd.f32 %v2328_v55, %v543_v25  ;;  %1591 = vmatmul.mubr.f32.gmra.mxu1 %v604_v24 }
 0x110   : > { %v1506_v27 = vpop.f32.mrf.mxu0  ;;  %1593 = vmatprep.mubr.msk.f32.mxu1 %vm1989_vm0, %v1988_v0 }
 0x111   : > { %v605_v28 = vmax.f32 %v544_v26, 0.0 }
 0x112   : > { %v548_v29 = vpop.f32.mrf.mxu0 }
 0x113   : > { %v549_v30 = vadd.f32 %v2328_v55, %v548_v29  ;;  %1594 = vmatmul.mubr.f32.gmra.mxu1 %v605_v28 }
 0x114   : > { %v1509_v31 = vpop.f32.mrf.mxu0  ;;  %1596 = vmatprep.mubr.msk.f32.mxu1 %vm1989_vm0, %v1988_v0 }
 0x115   : > { %v606_v32 = vmax.f32 %v549_v30, 0.0 }
 0x116   : > { %v553_v33 = vpop.f32.mrf.mxu0 }
 0x117   : > { %v554_v34 = vadd.f32 %v2328_v55, %v553_v33  ;;  %1597 = vmatmul.mubr.f32.gmra.mxu1 %v606_v32 }
 0x118   : > { %v1512_v35 = vpop.f32.mrf.mxu0  ;;  %1599 = vmatprep.mubr.msk.f32.mxu1 %vm1989_vm0, %v1988_v0 }
 0x119   : > { %v607_v36 = vmax.f32 %v554_v34, 0.0 }
 0x11a   : > { %v558_v37 = vpop.f32.mrf.mxu0 }
 0x11b   : > { %v559_v38 = vadd.f32 %v2328_v55, %v558_v37  ;;  %1600 = vmatmul.mubr.f32.gmra.mxu1 %v607_v36 }
 0x11c   : > { %v1515_v39 = vpop.f32.mrf.mxu0  ;;  %1602 = vmatprep.mubr.msk.f32.mxu1 %vm1989_vm0, %v1988_v0 }
 0x11d   : > { %v608_v40 = vmax.f32 %v559_v38, 0.0 }
 0x11e   : > { %v563_v41 = vpop.f32.mrf.mxu0 }
 0x11f   : > { %v564_v42 = vadd.f32 %v2328_v55, %v563_v41  ;;  %1603 = vmatmul.mubr.f32.gmra.mxu1 %v608_v40 }
 0x120   : > { %v1518_v43 = vpop.f32.mrf.mxu0  ;;  %1605 = vmatprep.mubr.msk.f32.mxu1 %vm1989_vm0, %v1988_v0 }
 0x121   : > { %v609_v44 = vmax.f32 %v564_v42, 0.0 }
 0x122   : > { %v568_v45 = vpop.f32.mrf.mxu0 }
 0x123   : > { %v569_v46 = vadd.f32 %v2328_v55, %v568_v45  ;;  %1606 = vmatmul.mubr.f32.gmra.mxu1 %v609_v44 }
 0x124   : > { %v1521_v47 = vpop.f32.mrf.mxu0  ;;  %1608 = vmatprep.mubr.msk.f32.mxu1 %vm1989_vm0, %v1988_v0 }
 0x125   : > { %v610_v48 = vmax.f32 %v569_v46, 0.0 }
 0x126   : > { %v573_v49 = vpop.f32.mrf.mxu0 }
 0x127   : > { %v574_v50 = vadd.f32 %v2328_v55, %v573_v49  ;;  %1609 = vmatmul.mubr.f32.gmra.mxu1 %v610_v48 }
 0x128   : > { %v1524_v51 = vpop.f32.mrf.mxu0  ;;  %1611 = vmatprep.mubr.msk.f32.mxu1 %vm1989_vm0, %v1988_v0 }
 0x129   : > { %v611_v52 = vmax.f32 %v574_v50, 0.0 }
 0x12a   : > { %v578_v53 = vpop.f32.mrf.mxu0 }
 0x12b   : > { %v579_v54 = vadd.f32 %v2328_v55, %v578_v53  ;;  %1612 = vmatmul.mubr.f32.gmra.mxu1 %v611_v52 }
 0x12c   : > { %v1527_v56 = vpop.f32.mrf.mxu0  ;;  %1614 = vmatprep.mubr.msk.f32.mxu1 %vm1989_vm0, %v1988_v0 }
 0x12d   : > { %v612_v57 = vmax.f32 %v579_v54, 0.0 }
 0x12e   : > { %v583_v58 = vpop.f32.mrf.mxu0 }
 0x12f   : > { %v584_v59 = vadd.f32 %v2328_v55, %v583_v58  ;;  %1615 = vmatmul.mubr.f32.gmra.mxu1 %v612_v57 }
 0x130   : > { %v1530_v60 = vpop.f32.mrf.mxu0  ;;  %1617 = vmatprep.mubr.msk.f32.mxu1 %vm1989_vm0, %v1988_v0 }
 0x131   : > { %v613_v61 = vmax.f32 %v584_v59, 0.0 }
 0x132   : > { %v588_v62 = vpop.f32.mrf.mxu0 }
 0x133   : > { %v589_v63 = vadd.f32 %v2328_v55, %v588_v62  ;;  %1618 = vmatmul.mubr.f32.gmra.mxu1 %v613_v61 }
 0x134   : > { %v1533_v1 = vpop.f32.mrf.mxu0  ;;  %1620 = vmatprep.mubr.msk.f32.mxu1 %vm1989_vm0, %v1988_v0 }
 0x135   : > { %v614_v2 = vmax.f32 %v589_v63, 0.0 }
 0x136   : > { %v593_v3 = vpop.f32.mrf.mxu0 }
 0x137   : > { %v594_v5 = vadd.f32 %v2328_v55, %v593_v3  ;;  %1621 = vmatmul.mubr.f32.gmra.mxu1 %v614_v2  ;;  %v1034_v55 = vld [vmem:[%s2715_s7 + $0x70] sm:$0xff] }
 0x138   : > { %v1536_v6 = vpop.f32.mrf.mxu0  ;;  %1623 = vmatprep.mubr.msk.f32.mxu1 %vm1989_vm0, %v1988_v0  ;;  %1821 = vmatpush3.msra.mxu1 %v1034_v55 }
 0x139   : > { %v615_v7 = vmax.f32 %v594_v5, 0.0  ;;  %1806 = vmatprep.subr.mxu1 %v1988_v0 }
 0x13a   : > { %1822 = vmatpush3.msra.mxu1 %v1033_v9 }
 0x13b   : > { %1624 = vmatmul.mubr.f32.gmra.mxu1 %v615_v7  ;;  %1807 = vmatprep.subr.mxu1 %v1988_v0 }
 0x13c   : > { %1756 = vmatprep.mubr.msk.f32.mxu1 %vm1989_vm0, %v1988_v0  ;;  %1823 = vmatpush3.msra.mxu1 %v1032_v10 }
 0x13d   : > { %1808 = vmatprep.subr.mxu1 %v1988_v0 }
 0x13e   : > { %1824 = vmatpush3.msra.mxu1 %v1031_v11 }
 0x13f   : > { %1809 = vmatprep.subr.mxu1 %v1988_v0 }
 0x140   : > { %1825 = vmatpush3.msra.mxu1 %v1030_v12 }
 0x141   : > { %1810 = vmatprep.subr.mxu1 %v1988_v0 }
 0x142   : > { %1826 = vmatpush3.msra.mxu1 %v1029_v13 }
 0x143   : > { %1811 = vmatprep.subr.mxu1 %v1988_v0 }
 0x144   : > { %1827 = vmatpush3.msra.mxu1 %v1028_v14 }
 0x145   : > { %1812 = vmatprep.subr.mxu1 %v1988_v0 }
 0x146   : > { %1828 = vmatpush3.msra.mxu1 %v2426_v15 }
 0x147   : > { %1813 = vmatprep.subr.mxu1 %v1988_v0 }
 0x148   : > { %1829 = vmatpush3.msra.mxu1 %v2433_v16 }
 0x149   : > { %1814 = vmatprep.subr.mxu1 %v1988_v0 }
 0x14a   : > { %1830 = vmatpush3.msra.mxu1 %v2440_v17 }
 0x14b   : > { %1815 = vmatprep.subr.mxu1 %v1988_v0 }
 0x14c   : > { %1831 = vmatpush3.msra.mxu1 %v2447_v18 }
 0x14d   : > { %1816 = vmatprep.subr.mxu1 %v1988_v0 }
 0x14e   : > { %1832 = vmatpush3.msra.mxu1 %v2454_v19 }
 0x14f   : > { %1817 = vmatprep.subr.mxu1 %v1988_v0 }
 0x1b3   : > { %v705_v21 = vpop.f32.mrf.mxu1 }
 0x1b4   : > { %v706_v22 = vadd.f32 %v2461_v20, %v705_v21 }
 0x1b5   : > { %v1571_v23 = vpop.f32.mrf.mxu1 }
 0x1b6   : > { %v799_v24 = vmax.f32 %v706_v22, 0.0 }
 0x1b7   : > { %v710_v25 = vpop.f32.mrf.mxu1 }
 0x1b8   : > { %v711_v26 = vadd.f32 %v2461_v20, %v710_v25  ;;  %1659 = vmatmul.mubr.f32.vlgmr.msra.gmra.mxu0 %v799_v24 }
 0x1b9   : > { %v1574_v27 = vpop.f32.mrf.mxu1  ;;  %1661 = vmatprep.mubr.msk.f32.mxu0 %vm1989_vm0, %v1988_v0  ;;  %1716 = vmatpush3.msra.mxu0 %v1035_v8 }
 0x1ba   : > { %v800_v28 = vmax.f32 %v711_v26, 0.0  ;;  %1717 = vmatprep.subr.mxu0 %v1988_v0 }
 0x1bb   : > { %v715_v29 = vpop.f32.mrf.mxu1  ;;  %1718 = vmatpush3.msra.mxu0 %v1034_v55 }
 0x1bc   : > { %v716_v30 = vadd.f32 %v2461_v20, %v715_v29  ;;  %1662 = vmatmul.mubr.f32.gmra.mxu0 %v800_v28  ;;  %1719 = vmatprep.subr.mxu0 %v1988_v0  ;;  %v1022_v28 = vld [vmem:[%s2715_s7 + $0x10] sm:$0xff] }
 0x1bd   : > { %v1577_v31 = vpop.f32.mrf.mxu1  ;;  %1664 = vmatprep.mubr.msk.f32.mxu0 %vm1989_vm0, %v1988_v0  ;;  %1720 = vmatpush3.msra.mxu0 %v1033_v9 }
 0x1be   : > { %v801_v32 = vmax.f32 %v716_v30, 0.0  ;;  %1721 = vmatprep.subr.mxu0 %v1988_v0  ;;  %1833 = vmatpush3.msra.mxu1 %v1022_v28  ;;  %v1021_v31 = vld [vmem:[%s2715_s7 + $0x8] sm:$0xff] }
 0x1bf   : > { %v720_v33 = vpop.f32.mrf.mxu1  ;;  %1722 = vmatpush3.msra.mxu0 %v1032_v10  ;;  %1818 = vmatprep.subr.mxu1 %v1988_v0 }
 0x1c0   : > { %v721_v34 = vadd.f32 %v2461_v20, %v720_v33  ;;  %1665 = vmatmul.mubr.f32.gmra.mxu0 %v801_v32  ;;  %1723 = vmatprep.subr.mxu0 %v1988_v0 }
 0x1c1   : > { %v1580_v35 = vpop.f32.mrf.mxu1  ;;  %1667 = vmatprep.mubr.msk.f32.mxu0 %vm1989_vm0, %v1988_v0  ;;  %1724 = vmatpush3.msra.mxu0 %v1031_v11 }
 0x1c2   : > { %v802_v36 = vmax.f32 %v721_v34, 0.0  ;;  %1725 = vmatprep.subr.mxu0 %v1988_v0  ;;  %v1020_v34 = vld [vmem:[%s2715_s7] sm:$0xff]  ;;  %1834 = vmatpush3.msra.mxu1 %v1021_v31 }
 0x1c3   : > { %v725_v37 = vpop.f32.mrf.mxu1  ;;  %1726 = vmatpush3.msra.mxu0 %v1030_v12  ;;  %1819 = vmatprep.subr.mxu1 %v1988_v0 }
 0x1c4   : > { %v726_v38 = vadd.f32 %v2461_v20, %v725_v37  ;;  %1668 = vmatmul.mubr.f32.gmra.mxu0 %v802_v36  ;;  %1727 = vmatprep.subr.mxu0 %v1988_v0 }
 0x1c5   : > { %v1583_v39 = vpop.f32.mrf.mxu1  ;;  %1670 = vmatprep.mubr.msk.f32.mxu0 %vm1989_vm0, %v1988_v0  ;;  %1728 = vmatpush3.msra.mxu0 %v1029_v13 }
 0x1c6   : > { %v803_v40 = vmax.f32 %v726_v38, 0.0  ;;  %1729 = vmatprep.subr.mxu0 %v1988_v0  ;;  %1835 = vmatpush3.msra.mxu1 %v1020_v34 }
 0x1c7   : > { %v730_v41 = vpop.f32.mrf.mxu1  ;;  %1730 = vmatpush3.msra.mxu0 %v1028_v14 }
 0x1c8   : > { %v731_v42 = vadd.f32 %v2461_v20, %v730_v41  ;;  %1671 = vmatmul.mubr.f32.gmra.mxu0 %v803_v40  ;;  %1731 = vmatprep.subr.mxu0 %v1988_v0 }
 0x1c9   : > { %v1586_v43 = vpop.f32.mrf.mxu1  ;;  %1673 = vmatprep.mubr.msk.f32.mxu0 %vm1989_vm0, %v1988_v0  ;;  %1732 = vmatpush3.msra.mxu0 %v2426_v15 }
 0x1ca   : > { %v804_v44 = vmax.f32 %v731_v42, 0.0  ;;  %1733 = vmatprep.subr.mxu0 %v1988_v0 }
 0x1cb   : > { %v735_v45 = vpop.f32.mrf.mxu1  ;;  %1734 = vmatpush3.msra.mxu0 %v2433_v16 }
 0x1cc   : > { %v736_v46 = vadd.f32 %v2461_v20, %v735_v45  ;;  %1674 = vmatmul.mubr.f32.gmra.mxu0 %v804_v44  ;;  %1735 = vmatprep.subr.mxu0 %v1988_v0 }
 0x1cd   : > { %v1589_v47 = vpop.f32.mrf.mxu1  ;;  %1676 = vmatprep.mubr.msk.f32.mxu0 %vm1989_vm0, %v1988_v0  ;;  %1736 = vmatpush3.msra.mxu0 %v2440_v17 }
 0x1ce   : > { %v805_v48 = vmax.f32 %v736_v46, 0.0  ;;  %1737 = vmatprep.subr.mxu0 %v1988_v0 }
 0x1cf   : > { %v740_v49 = vpop.f32.mrf.mxu1  ;;  %1738 = vmatpush3.msra.mxu0 %v2447_v18 }
 0x1d0   : > { %v741_v50 = vadd.f32 %v2461_v20, %v740_v49  ;;  %1677 = vmatmul.mubr.f32.gmra.mxu0 %v805_v48  ;;  %1739 = vmatprep.subr.mxu0 %v1988_v0 }
 0x1d1   : > { %v1592_v51 = vpop.f32.mrf.mxu1  ;;  %1679 = vmatprep.mubr.msk.f32.mxu0 %vm1989_vm0, %v1988_v0  ;;  %1740 = vmatpush3.msra.mxu0 %v2454_v19 }
 0x1d2   : > { %v806_v52 = vmax.f32 %v741_v50, 0.0  ;;  %1741 = vmatprep.subr.mxu0 %v1988_v0 }
 0x1d3   : > { %v745_v53 = vpop.f32.mrf.mxu1  ;;  %1742 = vmatpush3.msra.mxu0 %v1022_v28 }
 0x1d4   : > { %v746_v54 = vadd.f32 %v2461_v20, %v745_v53  ;;  %1680 = vmatmul.mubr.f32.gmra.mxu0 %v806_v52  ;;  %1743 = vmatprep.subr.mxu0 %v1988_v0 }
 0x1d5   : > { %v1595_v56 = vpop.f32.mrf.mxu1  ;;  %1682 = vmatprep.mubr.msk.f32.mxu0 %vm1989_vm0, %v1988_v0  ;;  %1744 = vmatpush3.msra.mxu0 %v1021_v31 }
 0x1d6   : > { %v807_v57 = vmax.f32 %v746_v54, 0.0  ;;  %1745 = vmatprep.subr.mxu0 %v1988_v0 }
 0x1d7   : > { %v750_v58 = vpop.f32.mrf.mxu1  ;;  %1746 = vmatpush3.msra.mxu0 %v1020_v34 }
 0x1d8   : > { %v751_v59 = vadd.f32 %v2461_v20, %v750_v58  ;;  %1683 = vmatmul.mubr.f32.gmra.mxu0 %v807_v57 }
 0x1d9   : > { %v1598_v60 = vpop.f32.mrf.mxu1  ;;  %1685 = vmatprep.mubr.msk.f32.mxu0 %vm1989_vm0, %v1988_v0 }
 0x1da   : > { %v808_v61 = vmax.f32 %v751_v59, 0.0 }
 0x1db   : > { %v755_v62 = vpop.f32.mrf.mxu1 }
 0x1dc   : > { %v756_v63 = vadd.f32 %v2461_v20, %v755_v62  ;;  %1686 = vmatmul.mubr.f32.gmra.mxu0 %v808_v61 }
 0x1dd   : > { %v1601_v1 = vpop.f32.mrf.mxu1  ;;  %1688 = vmatprep.mubr.msk.f32.mxu0 %vm1989_vm0, %v1988_v0 }
 0x1de   : > { %v809_v2 = vmax.f32 %v756_v63, 0.0 }
 0x1df   : > { %v760_v3 = vpop.f32.mrf.mxu1 }
 0x1e0   : > { %v761_v4 = vadd.f32 %v2461_v20, %v760_v3  ;;  %1689 = vmatmul.mubr.f32.gmra.mxu0 %v809_v2 }
 0x1e1   : > { %v1604_v5 = vpop.f32.mrf.mxu1  ;;  %1691 = vmatprep.mubr.msk.f32.mxu0 %vm1989_vm0, %v1988_v0 }
 0x1e2   : > { %v810_v6 = vmax.f32 %v761_v4, 0.0 }
 0x1e3   : > { %v765_v7 = vpop.f32.mrf.mxu1 }
 0x1e4   : > { %v766_v8 = vadd.f32 %v2461_v20, %v765_v7  ;;  %1692 = vmatmul.mubr.f32.gmra.mxu0 %v810_v6 }
 0x1e5   : > { %v1607_v55 = vpop.f32.mrf.mxu1  ;;  %1694 = vmatprep.mubr.msk.f32.mxu0 %vm1989_vm0, %v1988_v0 }
 0x1e6   : > { %v811_v9 = vmax.f32 %v766_v8, 0.0 }
 0x1e7   : > { %v770_v10 = vpop.f32.mrf.mxu1 }
 0x1e8   : > { %v771_v11 = vadd.f32 %v2461_v20, %v770_v10  ;;  %1695 = vmatmul.mubr.f32.gmra.mxu0 %v811_v9 }
 0x1e9   : > { %v1610_v12 = vpop.f32.mrf.mxu1  ;;  %1697 = vmatprep.mubr.msk.f32.mxu0 %vm1989_vm0, %v1988_v0 }
 0x1ea   : > { %v812_v13 = vmax.f32 %v771_v11, 0.0 }
 0x1eb   : > { %v775_v14 = vpop.f32.mrf.mxu1 }
 0x1ec   : > { %v776_v15 = vadd.f32 %v2461_v20, %v775_v14  ;;  %1698 = vmatmul.mubr.f32.gmra.mxu0 %v812_v13 }
 0x1ed   : > { %v1613_v16 = vpop.f32.mrf.mxu1  ;;  %1700 = vmatprep.mubr.msk.f32.mxu0 %vm1989_vm0, %v1988_v0 }
 0x1ee   : > { %v813_v17 = vmax.f32 %v776_v15, 0.0 }
 0x1ef   : > { %v780_v18 = vpop.f32.mrf.mxu1 }
 0x1f0   : > { %v781_v19 = vadd.f32 %v2461_v20, %v780_v18  ;;  %1701 = vmatmul.mubr.f32.gmra.mxu0 %v813_v17 }
 0x1f1   : > { %v1616_v21 = vpop.f32.mrf.mxu1  ;;  %1703 = vmatprep.mubr.msk.f32.mxu0 %vm1989_vm0, %v1988_v0 }
 0x1f2   : > { %v814_v22 = vmax.f32 %v781_v19, 0.0 }
 0x1f3   : > { %v785_v23 = vpop.f32.mrf.mxu1 }
 0x1f4   : > { %v786_v24 = vadd.f32 %v2461_v20, %v785_v23  ;;  %1704 = vmatmul.mubr.f32.gmra.mxu0 %v814_v22 }
 0x1f5   : > { %v1619_v25 = vpop.f32.mrf.mxu1  ;;  %1706 = vmatprep.mubr.msk.f32.mxu0 %vm1989_vm0, %v1988_v0 }
 0x1f6   : > { %v815_v26 = vmax.f32 %v786_v24, 0.0 }
 0x1f7   : > { %v790_v27 = vpop.f32.mrf.mxu1 }
 0x1f8   : > { %v791_v29 = vadd.f32 %v2461_v20, %v790_v27  ;;  %1707 = vmatmul.mubr.f32.gmra.mxu0 %v815_v26 }
 0x1f9   : > { %v1622_v30 = vpop.f32.mrf.mxu1  ;;  %1709 = vmatprep.mubr.msk.f32.mxu0 %vm1989_vm0, %v1988_v0 }
 0x1fa   : > { %v816_v32 = vmax.f32 %v791_v29, 0.0 }
 0x1fb   : > { %v795_v33 = vpop.f32.mrf.mxu1 }
 0x1fc   : > { %v796_v35 = vadd.f32 %v2461_v20, %v795_v33  ;;  %1710 = vmatmul.mubr.f32.gmra.mxu0 %v816_v32  ;;  %v2554_v20 = vld [vmem:[%s2714_s6] ss:$0 sm:$0xff] }
 0x1fd   : > { %v1625_v36 = vpop.f32.mrf.mxu1  ;;  %1712 = vmatprep.mubr.msk.f32.mxu0 %vm1989_vm0, %v1988_v0 }
 0x1fe   : > { %v817_v37 = vmax.f32 %v796_v35, 0.0 }
 0x200   : > { %1713 = vmatmul.mubr.f32.gmra.mxu0 %v817_v37 }
 0x201   : > { %1747 = vmatprep.mubr.msk.f32.mxu0 %vm1989_vm0, %v1988_v0 }
 0x278   : > { %v907_v38 = vpop.f32.mrf.mxu0 }
 0x279   : > { %v908_v39 = vadd.f32 %v2554_v20, %v907_v38 }
 0x27a   : > { %v1660_v40 = vpop.f32.mrf.mxu0 }
 0x27b   : > { %v1001_v41 = vmax.f32 %v908_v39, 0.0 }
 0x27c   : > { %v912_v42 = vpop.f32.mrf.mxu0 }
 0x27d   : > { %v913_v43 = vadd.f32 %v2554_v20, %v912_v42  ;;  %1748 = vmatmul.mubr.f32.vlgmr.msra.gmra.mxu0 %v1001_v41 }
 0x27e   : > { %v1663_v44 = vpop.f32.mrf.mxu0  ;;  %1750 = vmatprep.mubr.msk.f32.mxu0 %vm1989_vm0, %v1988_v0 }
 0x27f   : > { %v1002_v45 = vmax.f32 %v913_v43, 0.0 }
 0x280   : > { %v917_v46 = vpop.f32.mrf.mxu0 }
 0x281   : > { %v918_v47 = vadd.f32 %v2554_v20, %v917_v46  ;;  %1751 = vmatmul.mubr.f32.gmra.mxu0 %v1002_v45 }
 0x282   : > { %v1666_v48 = vpop.f32.mrf.mxu0  ;;  %1753 = vmatprep.mubr.msk.f32.mxu0 %vm1989_vm0, %v1988_v0 }
 0x283   : > { %v1003_v49 = vmax.f32 %v918_v47, 0.0 }
 0x284   : > { %v922_v50 = vpop.f32.mrf.mxu0 }
 0x285   : > { %v923_v51 = vadd.f32 %v2554_v20, %v922_v50  ;;  %1754 = vmatmul.mubr.f32.gmra.mxu0 %v1003_v49 }
 0x286   : > { %v1669_v52 = vpop.f32.mrf.mxu0 }
 0x287   : > { %v1004_v53 = vmax.f32 %v923_v51, 0.0  ;;  %v2615_v52 = vld [vmem:[%s2716_s8] ss:$0 sm:$0xff] }
 0x288   : > { %v927_v54 = vpop.f32.mrf.mxu0 }
 0x289   : > { %v928_v56 = vadd.f32 %v2554_v20, %v927_v54  ;;  %1757 = vmatmul.mubr.f32.vlgmr.msra.gmra.mxu1 %v1004_v53 }
 0x28a   : > { %v1672_v57 = vpop.f32.mrf.mxu0  ;;  %1759 = vmatprep.mubr.msk.f32.mxu1 %vm1989_vm0, %v1988_v0 }
 0x28b   : > { %v1005_v58 = vmax.f32 %v928_v56, 0.0 }
 0x28c   : > { %v932_v59 = vpop.f32.mrf.mxu0 }
 0x28d   : > { %v933_v60 = vadd.f32 %v2554_v20, %v932_v59  ;;  %1760 = vmatmul.mubr.f32.gmra.mxu1 %v1005_v58 }
 0x28e   : > { %v1675_v61 = vpop.f32.mrf.mxu0  ;;  %1762 = vmatprep.mubr.msk.f32.mxu1 %vm1989_vm0, %v1988_v0 }
 0x28f   : > { %v1006_v62 = vmax.f32 %v933_v60, 0.0 }
 0x290   : > { %v937_v63 = vpop.f32.mrf.mxu0 }
 0x291   : > { %v938_v1 = vadd.f32 %v2554_v20, %v937_v63  ;;  %1763 = vmatmul.mubr.f32.gmra.mxu1 %v1006_v62 }
 0x292   : > { %v1678_v2 = vpop.f32.mrf.mxu0  ;;  %1765 = vmatprep.mubr.msk.f32.mxu1 %vm1989_vm0, %v1988_v0 }
 0x293   : > { %v1007_v3 = vmax.f32 %v938_v1, 0.0 }
 0x294   : > { %v942_v4 = vpop.f32.mrf.mxu0 }
 0x295   : > { %v943_v5 = vadd.f32 %v2554_v20, %v942_v4  ;;  %1766 = vmatmul.mubr.f32.gmra.mxu1 %v1007_v3 }
 0x296   : > { %v1681_v6 = vpop.f32.mrf.mxu0  ;;  %1768 = vmatprep.mubr.msk.f32.mxu1 %vm1989_vm0, %v1988_v0 }
 0x297   : > { %v1008_v7 = vmax.f32 %v943_v5, 0.0 }
 0x298   : > { %v947_v8 = vpop.f32.mrf.mxu0 }
 0x299   : > { %v948_v55 = vadd.f32 %v2554_v20, %v947_v8  ;;  %1769 = vmatmul.mubr.f32.gmra.mxu1 %v1008_v7 }
 0x29a   : > { %v1684_v9 = vpop.f32.mrf.mxu0  ;;  %1771 = vmatprep.mubr.msk.f32.mxu1 %vm1989_vm0, %v1988_v0 }
 0x29b   : > { %v1009_v10 = vmax.f32 %v948_v55, 0.0 }
 0x29c   : > { %v952_v11 = vpop.f32.mrf.mxu0 }
 0x29d   : > { %v953_v12 = vadd.f32 %v2554_v20, %v952_v11  ;;  %1772 = vmatmul.mubr.f32.gmra.mxu1 %v1009_v10 }
 0x29e   : > { %v1687_v13 = vpop.f32.mrf.mxu0  ;;  %1774 = vmatprep.mubr.msk.f32.mxu1 %vm1989_vm0, %v1988_v0 }
 0x29f   : > { %v1010_v14 = vmax.f32 %v953_v12, 0.0 }
 0x2a0   : > { %v957_v15 = vpop.f32.mrf.mxu0 }
 0x2a1   : > { %v958_v16 = vadd.f32 %v2554_v20, %v957_v15  ;;  %1775 = vmatmul.mubr.f32.gmra.mxu1 %v1010_v14 }
 0x2a2   : > { %v1690_v17 = vpop.f32.mrf.mxu0  ;;  %1777 = vmatprep.mubr.msk.f32.mxu1 %vm1989_vm0, %v1988_v0 }
 0x2a3   : > { %v1011_v18 = vmax.f32 %v958_v16, 0.0 }
 0x2a4   : > { %v962_v19 = vpop.f32.mrf.mxu0 }
 0x2a5   : > { %v963_v21 = vadd.f32 %v2554_v20, %v962_v19  ;;  %1778 = vmatmul.mubr.f32.gmra.mxu1 %v1011_v18 }
 0x2a6   : > { %v1693_v22 = vpop.f32.mrf.mxu0  ;;  %1780 = vmatprep.mubr.msk.f32.mxu1 %vm1989_vm0, %v1988_v0 }
 0x2a7   : > { %v1012_v23 = vmax.f32 %v963_v21, 0.0 }
 0x2a8   : > { %v967_v24 = vpop.f32.mrf.mxu0 }
 0x2a9   : > { %v968_v25 = vadd.f32 %v2554_v20, %v967_v24  ;;  %1781 = vmatmul.mubr.f32.gmra.mxu1 %v1012_v23 }
 0x2aa   : > { %v1696_v26 = vpop.f32.mrf.mxu0  ;;  %1783 = vmatprep.mubr.msk.f32.mxu1 %vm1989_vm0, %v1988_v0 }
 0x2ab   : > { %v1013_v27 = vmax.f32 %v968_v25, 0.0 }
 0x2ac   : > { %v972_v28 = vpop.f32.mrf.mxu0 }
 0x2ad   : > { %v973_v29 = vadd.f32 %v2554_v20, %v972_v28  ;;  %1784 = vmatmul.mubr.f32.gmra.mxu1 %v1013_v27 }
 0x2ae   : > { %v1699_v30 = vpop.f32.mrf.mxu0  ;;  %1786 = vmatprep.mubr.msk.f32.mxu1 %vm1989_vm0, %v1988_v0 }
 0x2af   : > { %v1014_v31 = vmax.f32 %v973_v29, 0.0 }
 0x2b0   : > { %v977_v32 = vpop.f32.mrf.mxu0 }
 0x2b1   : > { %v978_v33 = vadd.f32 %v2554_v20, %v977_v32  ;;  %1787 = vmatmul.mubr.f32.gmra.mxu1 %v1014_v31 }
 0x2b2   : > { %v1702_v34 = vpop.f32.mrf.mxu0  ;;  %1789 = vmatprep.mubr.msk.f32.mxu1 %vm1989_vm0, %v1988_v0 }
 0x2b3   : > { %v1015_v35 = vmax.f32 %v978_v33, 0.0 }
 0x2b4   : > { %v982_v36 = vpop.f32.mrf.mxu0 }
 0x2b5   : > { %v983_v37 = vadd.f32 %v2554_v20, %v982_v36  ;;  %1790 = vmatmul.mubr.f32.gmra.mxu1 %v1015_v35 }
 0x2b6   : > { %v1705_v38 = vpop.f32.mrf.mxu0  ;;  %1792 = vmatprep.mubr.msk.f32.mxu1 %vm1989_vm0, %v1988_v0 }
 0x2b7   : > { %v1016_v39 = vmax.f32 %v983_v37, 0.0 }
 0x2b8   : > { %v987_v40 = vpop.f32.mrf.mxu0 }
 0x2b9   : > { %v988_v41 = vadd.f32 %v2554_v20, %v987_v40  ;;  %1793 = vmatmul.mubr.f32.gmra.mxu1 %v1016_v39 }
 0x2ba   : > { %v1708_v42 = vpop.f32.mrf.mxu0  ;;  %1795 = vmatprep.mubr.msk.f32.mxu1 %vm1989_vm0, %v1988_v0 }
 0x2bb   : > { %v1017_v43 = vmax.f32 %v988_v41, 0.0 }
 0x2bc   : > { %v992_v44 = vpop.f32.mrf.mxu0 }
 0x2bd   : > { %v993_v45 = vadd.f32 %v2554_v20, %v992_v44  ;;  %1796 = vmatmul.mubr.f32.gmra.mxu1 %v1017_v43 }
 0x2be   : > { %v1711_v46 = vpop.f32.mrf.mxu0  ;;  %1798 = vmatprep.mubr.msk.f32.mxu1 %vm1989_vm0, %v1988_v0 }
 0x2bf   : > { %v1018_v47 = vmax.f32 %v993_v45, 0.0 }
 0x2c0   : > { %v997_v48 = vpop.f32.mrf.mxu0 }
 0x2c1   : > { %v998_v49 = vadd.f32 %v2554_v20, %v997_v48  ;;  %1799 = vmatmul.mubr.f32.gmra.mxu1 %v1018_v47 }
 0x2c2   : > { %v1714_v50 = vpop.f32.mrf.mxu0  ;;  %1801 = vmatprep.mubr.msk.f32.mxu1 %vm1989_vm0, %v1988_v0 }
 0x2c3   : > { %v1019_v51 = vmax.f32 %v998_v49, 0.0 }
 0x2c5   : > { %1802 = vmatmul.mubr.f32.gmra.mxu1 %v1019_v51 }
 0x33d   : > { %v1109_v53 = vpop.f32.mrf.mxu0 }
 0x33e   : > { %v1110_v54 = vadd.f32 %v2615_v52, %v1109_v53 }
 0x33f   : > { %v1749_v56 = vpop.f32.mrf.mxu0 }
 0x340   : > { %1203 = vst [vmem:[%s2618_s23] sm:$0xff] %v1110_v54 }
 0x341   : > { %v1114_v0 = vpop.f32.mrf.mxu0 }
 0x342   : > { %v1115_v20 = vadd.f32 %v2615_v52, %v1114_v0 }
 0x343   : > { %v1752_v57 = vpop.f32.mrf.mxu0 }
 0x344   : > { %1204 = vst [vmem:[%s2618_s23 + $0x8] sm:$0xff] %v1115_v20 }
 0x345   : > { %v1119_v58 = vpop.f32.mrf.mxu0 }
 0x346   : > { %v1120_v59 = vadd.f32 %v2615_v52, %v1119_v58 }
 0x347   : > { %v1755_v60 = vpop.f32.mrf.mxu0 }
 0x348   : > { %1205 = vst [vmem:[%s2618_s23 + $0x10] sm:$0xff] %v1120_v59 }
 0x349   : > { %v1124_v61 = vpop.f32.mrf.mxu1 }
 0x34a   : > { %v1125_v62 = vadd.f32 %v2615_v52, %v1124_v61 }
 0x34b   : > { %v1758_v63 = vpop.f32.mrf.mxu1 }
 0x34c   : > { %1206 = vst [vmem:[%s2618_s23 + $0x18] sm:$0xff] %v1125_v62 }
 0x34d   : > { %v1129_v1 = vpop.f32.mrf.mxu1 }
 0x34e   : > { %v1130_v2 = vadd.f32 %v2615_v52, %v1129_v1 }
 0x34f   : > { %v1761_v3 = vpop.f32.mrf.mxu1 }
 0x350   : > { %1207 = vst [vmem:[%s2618_s23 + $0x20] sm:$0xff] %v1130_v2 }
 0x351   : > { %v1134_v4 = vpop.f32.mrf.mxu1 }
 0x352   : > { %v1135_v5 = vadd.f32 %v2615_v52, %v1134_v4 }
 0x353   : > { %v1764_v6 = vpop.f32.mrf.mxu1 }
 0x354   : > { %1208 = vst [vmem:[%s2618_s23 + $0x28] sm:$0xff] %v1135_v5 }
 0x355   : > { %v1139_v7 = vpop.f32.mrf.mxu1 }
 0x356   : > { %v1140_v8 = vadd.f32 %v2615_v52, %v1139_v7 }
 0x357   : > { %v1767_v55 = vpop.f32.mrf.mxu1 }
 0x358   : > { %1209 = vst [vmem:[%s2618_s23 + $0x30] sm:$0xff] %v1140_v8 }
 0x359   : > { %v1144_v9 = vpop.f32.mrf.mxu1 }
 0x35a   : > { %v1145_v10 = vadd.f32 %v2615_v52, %v1144_v9 }
 0x35b   : > { %v1770_v11 = vpop.f32.mrf.mxu1 }
 0x35c   : > { %1210 = vst [vmem:[%s2618_s23 + $0x38] sm:$0xff] %v1145_v10 }
 0x35d   : > { %v1149_v12 = vpop.f32.mrf.mxu1 }
 0x35e   : > { %v1150_v13 = vadd.f32 %v2615_v52, %v1149_v12 }
 0x35f   : > { %v1773_v14 = vpop.f32.mrf.mxu1 }
 0x360   : > { %1211 = vst [vmem:[%s2618_s23 + $0x40] sm:$0xff] %v1150_v13 }
 0x361   : > { %v1154_v15 = vpop.f32.mrf.mxu1 }
 0x362   : > { %v1155_v16 = vadd.f32 %v2615_v52, %v1154_v15 }
 0x363   : > { %v1776_v17 = vpop.f32.mrf.mxu1 }
 0x364   : > { %1212 = vst [vmem:[%s2618_s23 + $0x48] sm:$0xff] %v1155_v16 }
 0x365   : > { %v1159_v18 = vpop.f32.mrf.mxu1 }
 0x366   : > { %v1160_v19 = vadd.f32 %v2615_v52, %v1159_v18 }
 0x367   : > { %v1779_v21 = vpop.f32.mrf.mxu1 }
 0x368   : > { %1213 = vst [vmem:[%s2618_s23 + $0x50] sm:$0xff] %v1160_v19 }
 0x369   : > { %v1164_v22 = vpop.f32.mrf.mxu1 }
 0x36a   : > { %v1165_v23 = vadd.f32 %v2615_v52, %v1164_v22 }
 0x36b   : > { %v1782_v24 = vpop.f32.mrf.mxu1 }
 0x36c   : > { %1214 = vst [vmem:[%s2618_s23 + $0x58] sm:$0xff] %v1165_v23 }
 0x36d   : > { %v1169_v25 = vpop.f32.mrf.mxu1 }
 0x36e   : > { %v1170_v26 = vadd.f32 %v2615_v52, %v1169_v25 }
 0x36f   : > { %v1785_v27 = vpop.f32.mrf.mxu1 }
 0x370   : > { %1215 = vst [vmem:[%s2618_s23 + $0x60] sm:$0xff] %v1170_v26 }
 0x371   : > { %v1174_v28 = vpop.f32.mrf.mxu1 }
 0x372   : > { %v1175_v29 = vadd.f32 %v2615_v52, %v1174_v28 }
 0x373   : > { %v1788_v30 = vpop.f32.mrf.mxu1 }
 0x374   : > { %1216 = vst [vmem:[%s2618_s23 + $0x68] sm:$0xff] %v1175_v29 }
 0x375   : > { %v1179_v31 = vpop.f32.mrf.mxu1 }
 0x376   : > { %v1180_v32 = vadd.f32 %v2615_v52, %v1179_v31 }
 0x377   : > { %v1791_v33 = vpop.f32.mrf.mxu1 }
 0x378   : > { %1217 = vst [vmem:[%s2618_s23 + $0x70] sm:$0xff] %v1180_v32 }
 0x379   : > { %v1184_v34 = vpop.f32.mrf.mxu1 }
 0x37a   : > { %v1185_v35 = vadd.f32 %v2615_v52, %v1184_v34 }
 0x37b   : > { %v1794_v36 = vpop.f32.mrf.mxu1 }
 0x37c   : > { %1218 = vst [vmem:[%s2618_s23 + $0x78] sm:$0xff] %v1185_v35 }
 0x37d   : > { %v1189_v37 = vpop.f32.mrf.mxu1 }
 0x37e   : > { %v1190_v38 = vadd.f32 %v2615_v52, %v1189_v37 }
 0x37f   : > { %v1797_v39 = vpop.f32.mrf.mxu1 }
 0x380   : > { %1219 = vst [vmem:[%s2618_s23 + $0x80] sm:$0xff] %v1190_v38 }
 0x381   : > { %v1194_v40 = vpop.f32.mrf.mxu1 }
 0x382   : > { %v1195_v41 = vadd.f32 %v2615_v52, %v1194_v40 }
 0x383   : > { %v1800_v42 = vpop.f32.mrf.mxu1 }
 0x384   : > { %1220 = vst [vmem:[%s2618_s23 + $0x88] sm:$0xff] %v1195_v41 }
 0x385   : > { %v1199_v43 = vpop.f32.mrf.mxu1 }
 0x386   : > { %v1200_v44 = vadd.f32 %v2615_v52, %v1199_v43 }
 0x387   : > { %v1803_v45 = vpop.f32.mrf.mxu1 }
 0x388   : > { %1221 = vst [vmem:[%s2618_s23 + $0x90] sm:$0xff] %v1200_v44 }
 0x389   : > { %1932 = shalt.err (!%p1929_p0)
}
 0x38a   : > { %s1933_s14 = scalar_lea.hbm %s2660_s27, 2432  ;;  %s1937_s24 = scalar_lea.hbm %s2717_s9, 4864 }
 0x38b   : > { %p1934_p1 = scmp.ne.s32.totalorder %s2660_s27, %s1933_s14  ;;  %p1938_p4 = scmp.lt.s32.totalorder %s2660_s27, %s2717_s9 }
 0x38c   : > { %p1939_p7 = scmp.lt.s32.totalorder %s1937_s24, %s1933_s14 }
 0x38d   : > { %p1935_p2 = pnand %p1934_p1, %p2081_p5 }
 0x38e   : > { %p1940_p6 = por %p1939_p7, %p1938_p4 }
 0x38f   : > { %p1936_p3 = pneg %p1935_p2 }
 0x391   : > { %p1941_p8 = pnand %p1940_p6, %p1936_p3 }
 0x393   : > { %1944 = shalt.err (!%p1941_p8)
}
 0x394   : > { %s1991_s28 = smov 128   ;;  %s1992_s29 = smov 8  }
 0x395   : > { %1841 = dma.vmem_to_hbm [thread:$0]  (%p2081_p5), %s2662_s25, 2432, %s2660_s27, %s2668_s13, %s1991_s28, %s1991_s28, %s1992_s29  }
 0x396 PF: > { %p1853_p9 = scmp.ge.s32.totalorder %s1983_s12, 2  ;;  %s1251_s16 = sand.u32 1, %s1971_s30  }
 0x397   : > { %p2721_p10 = scmp.ne.s32.totalorder %s2719_s20, 0  ;;  %s1252_s17 = scalar_lea.sflag [#allocation4], %s1251_s16 }
 0x399   : > { %p1848_p11 = pnand %p1853_p9, %p2721_p10 }
 0x39b   : > { %p1849_p12 = pneg %p1848_p11 }
 0x39d   : > { %1966 = dma.done.wait (%p1849_p12), %s1252_s17, 2432  }
 0x39e   : > { %1968 = vsyncadd (%p1849_p12), %s1252_s17, 4294964864  ;;  %p20_p13 = scmp.ge.s32.totalorder %s2068_s15, 4   ;;  %s2722_s30 = smov %s1975_s10 }
 0x39f   : > { %s2723_s10 = smov %s1979_s11  ;;  %s2724_s11 = smov %s2079_s18 }
 0x3a0   : > { %s2725_s12 = smov %s2068_s15  ;;  %22 = sbr.rel (!%p20_p13) target bundleno = 4 (0x4), region = 96 }
 0x3a5   :  { %1257 = vsyncpa [#allocation3], 1 }
 0x3a6   :  { %1259 = vsyncpa [#allocation3 + $0x1], 1 }
 0x3a7   :  { %1260 = vsyncpa [#allocation4], 1 }
 0x3a8   :  { %1262 = vsyncpa [#allocation4 + $0x1], 1 }

</bundles_post_ra>
